<compile_context>
chip_gen: v7x
topology: tpu7x:2x2x1
jax: 0.10.0
libtpu: 0.0.40
codegen_flags: <defaults>
</compile_context>

<pallas_src>
import jax
import jax.numpy as jnp
from jax import lax
from jax.experimental import pallas as pl
from jax.experimental.pallas import tpu as pltpu


def _round_up(x, m):
    return ((x + m - 1) // m) * m


def reward_model_kernel(hs_ref, w1_ref, w2_ref, vecs_ref, out_ref):
    # vecs_ref rows: 0 = b1, 1 = b2, 2 = w3 (row), 3 = [b3, 0, ..., 0]   (f32)
    # fc1: (tile_b, H+S)bf16 @ (H+S, H)bf16 -> f32 accumulate, f32 bias/ReLU.
    x = jnp.dot(hs_ref[...], w1_ref[...],
                preferred_element_type=jnp.float32) + vecs_ref[0:1, :]
    x = jnp.maximum(x, 0.0)
    # fc2: bf16 operands (single MXU pass), f32 accumulate, f32 bias/ReLU.
    x = jnp.dot(x.astype(jnp.bfloat16), w2_ref[...],
                preferred_element_type=jnp.float32) + vecs_ref[1:2, :]
    x = jnp.maximum(x, 0.0)
    # fc3 as (1, H) x (tile_b, H)^T on the MXU: result is already the
    # lane-dense (1, tile_b) row we want to store (no cross-lane reduce,
    # no masked (tile_b, 1) partial stores).
    w3 = vecs_ref[2:3, :].astype(jnp.bfloat16)
    row = lax.dot_general(w3, x.astype(jnp.bfloat16),
                          dimension_numbers=(((1,), (1,)), ((), ())),
                          preferred_element_type=jnp.float32)
    out_ref[...] = row + vecs_ref[3:4, 0:1]          # scalar bias, lane-broadcast


def reward_model_forward(h, s, params, *, tile_b=2048):
    """h: (B, hidden_dim), s: (B, state_dim) -> (B, 1) float32."""
    B, H = h.shape
    S = s.shape[1]
    w1, b1, w2, b2, w3_row, b3 = params

    # Streamed input: cat([h, s]) fused with the bf16 cast (one HBM pass).
    hs = jnp.concatenate([h, s], axis=-1).astype(jnp.bfloat16)
    w1_bf = w1.astype(jnp.bfloat16)
    w2_bf = w2.astype(jnp.bfloat16)
    # Pack all small resident vectors into one (4, H) f32 array.
    vecs = jnp.concatenate(
        [b1, b2, w3_row, jnp.pad(b3, ((0, 0), (0, H - 1)))], axis=0)

    # Lane-dense output => batch tile must be a multiple of 128.
    tile_b = max(128, _round_up(tile_b, 128))
    b_pad = _round_up(B, 128)
    # Keep >= 2 grid steps when the batch allows (feeds v7x's second TC).
    tile_b = min(tile_b, _round_up(-(-b_pad // 2), 128))
    b_pad = _round_up(B, tile_b)
    if b_pad != B:
        hs = jnp.pad(hs, ((0, b_pad - B), (0, 0)))
    grid = (b_pad // tile_b,)

    flops = 2 * b_pad * ((H + S) * H + H * H + H)
    bytes_accessed = (2 * b_pad * (H + S)        # hs streamed (bf16)
                      + 2 * (H + S) * H          # w1 (bf16, resident)
                      + 2 * H * H                # w2 (bf16, resident)
                      + 4 * 4 * H                # packed b1/b2/w3/b3 (f32)
                      + 4 * b_pad)               # output (f32)

    out = pl.pallas_call(
        reward_model_kernel,
        out_shape=jax.ShapeDtypeStruct((1, b_pad), jnp.float32),
        grid=grid,
        in_specs=[
            pl.BlockSpec((tile_b, H + S), lambda i: (i, 0)),   # streamed hs tile
            pl.BlockSpec((H + S, H), lambda i: (0, 0)),        # w1  (VMEM-resident)
            pl.BlockSpec((H, H), lambda i: (0, 0)),            # w2  (VMEM-resident)
            pl.BlockSpec((4, H), lambda i: (0, 0)),            # b1/b2/w3/b3 (resident)
        ],
        out_specs=pl.BlockSpec((1, tile_b), lambda i: (0, i)), # lane-dense row
        compiler_params=pltpu.CompilerParams(
            dimension_semantics=("parallel",)),
        cost_estimate=pl.CostEstimate(flops=flops, transcendentals=0,
                                      bytes_accessed=bytes_accessed),
    )(hs, w1_bf, w2_bf, vecs)
    return out[0, :B].reshape(B, 1)


def init_reward_model_params(key, hidden_dim, state_dim):
    """Deterministic PyTorch-style init: U(-1/sqrt(fan_in), 1/sqrt(fan_in)).

    Weights are stored as (in_features, out_features) so the kernel uses them
    directly in x @ W form; fc3's weight is stored as a (1, hidden) row and its
    bias as a (1, 1) scalar (both packed into one resident array by the wrapper).
    """
    ks = jax.random.split(key, 6)
    in1 = hidden_dim + state_dim
    bnd1 = 1.0 / jnp.sqrt(in1)
    bnd2 = 1.0 / jnp.sqrt(hidden_dim)

    w1 = jax.random.uniform(ks[0], (in1, hidden_dim), jnp.float32, -bnd1, bnd1)
    b1 = jax.random.uniform(ks[1], (1, hidden_dim), jnp.float32, -bnd1, bnd1)
    w2 = jax.random.uniform(ks[2], (hidden_dim, hidden_dim), jnp.float32, -bnd2, bnd2)
    b2 = jax.random.uniform(ks[3], (1, hidden_dim), jnp.float32, -bnd2, bnd2)
    w3_row = jax.random.uniform(ks[4], (1, hidden_dim), jnp.float32, -bnd2, bnd2)
    b3 = jax.random.uniform(ks[5], (1, 1), jnp.float32, -bnd2, bnd2)
    return (w1, b1, w2, b2, w3_row, b3)


def reward_model_reference(h, s, params, *, match_kernel_precision=True):
    """Pure-JAX reference. If match_kernel_precision, mirrors the kernel's
    bf16-operand / f32-accumulate matmuls; otherwise all-f32 math."""
    w1, b1, w2, b2, w3_row, b3 = params
    x = jnp.concatenate([h, s], axis=-1)
    if match_kernel_precision:
        x = x.astype(jnp.bfloat16)
        w1 = w1.astype(jnp.bfloat16)
        w2 = w2.astype(jnp.bfloat16)
        w3_row = w3_row.astype(jnp.bfloat16)
    x = jnp.dot(x, w1, preferred_element_type=jnp.float32) + b1
    x = jnp.maximum(x, 0.0)
    if match_kernel_precision:
        x = x.astype(jnp.bfloat16)
    x = jnp.dot(x, w2, preferred_element_type=jnp.float32) + b2
    x = jnp.maximum(x, 0.0)
    if match_kernel_precision:
        x = x.astype(jnp.bfloat16)
    out = jnp.dot(x, w3_row.T, preferred_element_type=jnp.float32)
    return out + b3[0, 0]


if __name__ == "__main__":
    # Small shapes consistent with RewardModel(hidden_dim, state_dim).
    batch = 256
    hidden_dim = 32
    state_dim = 32

    key = jax.random.PRNGKey(0)
    k_h, k_s, k_p = jax.random.split(key, 3)
    h = jax.random.normal(k_h, (batch, hidden_dim), jnp.float32)
    s = jax.random.normal(k_s, (batch, state_dim), jnp.float32)
    params = init_reward_model_params(k_p, hidden_dim, state_dim)

    # Default tile_b logic yields tile_b=128 here -> a 2-step "parallel" grid,
    # exercising the software pipeline (and both TCs on v7x).
    out = reward_model_forward(h, s, params)
    out = jax.block_until_ready(out)
    assert out.shape == (batch, 1)

    # Exact check against a reference with matching bf16/f32 precision.
    ref_exact = reward_model_reference(h, s, params, match_kernel_precision=True)
    assert jnp.allclose(out, ref_exact, atol=1e-3, rtol=1e-3), \
        float(jnp.max(jnp.abs(out - ref_exact)))
    # Semantic check against the pure-f32 PyTorch-equivalent math.
    ref_f32 = reward_model_reference(h, s, params, match_kernel_precision=False)
    assert jnp.allclose(out, ref_f32, atol=5e-2, rtol=5e-2), \
        float(jnp.max(jnp.abs(out - ref_f32)))

    print("KERNEL_OK")
</pallas_src>

<mosaic_0001>
module attributes {stable_mosaic.version = 11 : i64} {
  func.func @reward_model_kernel(%arg0: i32, %arg1: memref<128x64xbf16, #tpu.memory_space<vmem>>, %arg2: memref<64x32xbf16, #tpu.memory_space<vmem>>, %arg3: memref<32x32xbf16, #tpu.memory_space<vmem>>, %arg4: memref<4x32xf32, #tpu.memory_space<vmem>>, %arg5: memref<1x128xf32, #tpu.memory_space<vmem>>) attributes {dimension_semantics = [#tpu.dimension_semantics<parallel>], iteration_bounds = array<i64: 2>, scalar_prefetch = 0 : i64, scratch_operands = 0 : i64, tpu.core_type = #tpu.core_type<tc>, window_params = [{transform_indices = @transform_0, window_bounds = array<i64: 128, 64>}, {pipeline_mode = #tpu.pipeline_mode<synchronous>, transform_indices = @transform_1, window_bounds = array<i64: 64, 32>}, {pipeline_mode = #tpu.pipeline_mode<synchronous>, transform_indices = @transform_2, window_bounds = array<i64: 32, 32>}, {pipeline_mode = #tpu.pipeline_mode<synchronous>, transform_indices = @transform_3, window_bounds = array<i64: 4, 32>}, {transform_indices = @transform_4, window_bounds = array<i64: 1, 128>}]} {
    %c0 = arith.constant 0 : index
    %c0_0 = arith.constant 0 : index
    %0 = vector.load %arg1[%c0, %c0_0] : memref<128x64xbf16, #tpu.memory_space<vmem>>, vector<128x64xbf16>
    %c0_1 = arith.constant 0 : index
    %c0_2 = arith.constant 0 : index
    %1 = vector.load %arg2[%c0_1, %c0_2] : memref<64x32xbf16, #tpu.memory_space<vmem>>, vector<64x32xbf16>
    %cst = arith.constant dense<0.000000e+00> : vector<128x32xf32>
    %2 = tpu.matmul %0, %1, %cst {dimension_numbers = #tpu.dot_dimension_numbers<[1], [0], [0], [1], [0, 0, 1, 1], [], []>} : vector<128x64xbf16>, vector<64x32xbf16>, vector<128x32xf32> -> vector<128x32xf32>
    %c0_3 = arith.constant 0 : index
    %c0_4 = arith.constant 0 : index
    %3 = vector.load %arg4[%c0_3, %c0_4] : memref<4x32xf32, #tpu.memory_space<vmem>>, vector<1x32xf32>
    %4 = vector.broadcast %3 : vector<1x32xf32> to vector<128x32xf32>
    %5 = arith.addf %2, %4 : vector<128x32xf32>
    %cst_5 = arith.constant 0.000000e+00 : f32
    %6 = vector.broadcast %cst_5 : f32 to vector<128x32xf32>
    %7 = arith.maximumf %5, %6 : vector<128x32xf32>
    %8 = arith.truncf %7 : vector<128x32xf32> to vector<128x32xbf16>
    %c0_6 = arith.constant 0 : index
    %c0_7 = arith.constant 0 : index
    %9 = vector.load %arg3[%c0_6, %c0_7] : memref<32x32xbf16, #tpu.memory_space<vmem>>, vector<32x32xbf16>
    %cst_8 = arith.constant dense<0.000000e+00> : vector<128x32xf32>
    %10 = tpu.matmul %8, %9, %cst_8 {dimension_numbers = #tpu.dot_dimension_numbers<[1], [0], [0], [1], [0, 0, 1, 1], [], []>} : vector<128x32xbf16>, vector<32x32xbf16>, vector<128x32xf32> -> vector<128x32xf32>
    %c1 = arith.constant 1 : index
    %c0_9 = arith.constant 0 : index
    %11 = vector.load %arg4[%c1, %c0_9] : memref<4x32xf32, #tpu.memory_space<vmem>>, vector<1x32xf32>
    %12 = vector.broadcast %11 : vector<1x32xf32> to vector<128x32xf32>
    %13 = arith.addf %10, %12 : vector<128x32xf32>
    %cst_10 = arith.constant 0.000000e+00 : f32
    %14 = vector.broadcast %cst_10 : f32 to vector<128x32xf32>
    %15 = arith.maximumf %13, %14 : vector<128x32xf32>
    %c2 = arith.constant 2 : index
    %c0_11 = arith.constant 0 : index
    %16 = vector.load %arg4[%c2, %c0_11] : memref<4x32xf32, #tpu.memory_space<vmem>>, vector<1x32xf32>
    %17 = arith.truncf %16 : vector<1x32xf32> to vector<1x32xbf16>
    %18 = arith.truncf %15 : vector<128x32xf32> to vector<128x32xbf16>
    %cst_12 = arith.constant dense<0.000000e+00> : vector<1x128xf32>
    %19 = tpu.matmul %17, %18, %cst_12 {dimension_numbers = #tpu.dot_dimension_numbers<[1], [1], [0], [0], [0, 0, 1, 0], [], []>} : vector<1x32xbf16>, vector<128x32xbf16>, vector<1x128xf32> -> vector<1x128xf32>
    %c3 = arith.constant 3 : index
    %c0_13 = arith.constant 0 : index
    %20 = vector.load %arg4[%c3, %c0_13] : memref<4x32xf32, #tpu.memory_space<vmem>>, vector<1x1xf32>
    %21 = vector.broadcast %20 : vector<1x1xf32> to vector<1x128xf32>
    %22 = arith.addf %19, %21 : vector<1x128xf32>
    %c0_14 = arith.constant 0 : index
    %c0_15 = arith.constant 0 : index
    %23 = vector.load %arg5[%c0_14, %c0_15] : memref<1x128xf32, #tpu.memory_space<vmem>>, vector<1x128xf32>
    tpu.vector_store %arg5[%c0_14, %c0_15], %22 {strides = array<i32>} : memref<1x128xf32, #tpu.memory_space<vmem>>, vector<1x128xf32>,
    return
  }
  func.func @transform_0(%arg0: i32) -> (i32, i32) {
    %c0_i32 = arith.constant 0 : i32
    %c0_i32_0 = arith.constant 0 : i32
    return %arg0, %c0_i32 : i32, i32
  }
  func.func @transform_1(%arg0: i32) -> (i32, i32) {
    %c0_i32 = arith.constant 0 : i32
    %c0_i32_0 = arith.constant 0 : i32
    %c0_i32_1 = arith.constant 0 : i32
    return %c0_i32, %c0_i32_0 : i32, i32
  }
  func.func @transform_2(%arg0: i32) -> (i32, i32) {
    %c0_i32 = arith.constant 0 : i32
    %c0_i32_0 = arith.constant 0 : i32
    %c0_i32_1 = arith.constant 0 : i32
    return %c0_i32, %c0_i32_0 : i32, i32
  }
  func.func @transform_3(%arg0: i32) -> (i32, i32) {
    %c0_i32 = arith.constant 0 : i32
    %c0_i32_0 = arith.constant 0 : i32
    %c0_i32_1 = arith.constant 0 : i32
    return %c0_i32, %c0_i32_0 : i32, i32
  }
  func.func @transform_4(%arg0: i32) -> (i32, i32) {
    %c0_i32 = arith.constant 0 : i32
    %c0_i32_0 = arith.constant 0 : i32
    return %c0_i32, %arg0 : i32, i32
  }
}

</mosaic_0001>

<bundles_post_ra>
// kernel: tpu_custom_call.1
= control target key start
LH: loop header
LB: loop body
LE: loop exit
PB: predicated region body
PF: predicated region fallthrough
CT: control target
= control target key end

     0   :  { %9 = vsyncpa [#allocation3], 0  ;;  %s1198_s0 = inlined_call_operand.vmem [shape: bf16[256,64], index: 0, kind: input, shape index: {}]   ;;  %s1199_s1 = inlined_call_operand.vmem [shape: bf16[64,32], index: 1, kind: input, shape index: {}]   ;;  %s1200_s2 = inlined_call_operand.vmem [shape: bf16[32,32], index: 2, kind: input, shape index: {}]   ;;  %s1201_s3 = inlined_call_operand.vmem [shape: f32[4,32], index: 3, kind: input, shape index: {}]   ;;  %s1202_s4 = inlined_call_operand.hbm [shape: f32[1,256], index: 4, kind: output, shape index: {}]  }
   0x1   :  { %11 = vsyncpa [#allocation3 + $0x1], 0  ;;  %s1035_s15 = smov 0   ;;  %s1037_s16 = smov 0  }
   0x2   :  { %s1039_s17 = smov 0   ;;  %s1041_s18 = smov 0  }
   0x3 LB: > { %s747_s19 = sadd.s32 4294967295, %s1004_s18   ;;  %s748_s20 = sadd.s32 4294967294, %s1004_s18   ;;  %s1004_s18 = sphi %s1041_s18, %s1208_s18   ;;  %s1000_s17 = sphi %s1039_s17, %s1207_s17   ;;  %s996_s16 = sphi %s1037_s16, %s1206_s16   ;;  %s992_s15 = sphi %s1035_s15, %s1205_s15  }
   0x4   : > { %s1058_s21 = sadd.s32 1, %s1004_s18   ;;  %s113_s22 = sadd.s32 1, %s1000_s17 }
   0x5   : > { %s110_s23 = ssub.s32 %s1004_s18, %s1058_s21  ;;  %p123_p0 = scmp.ne.s32.totalorder %s1000_s17, %s996_s16 }
   0x6   : > { %p111_p1 = scmp.eq.s32.totalorder %s110_s23, 0  ;;  %p124_p2 = scmp.eq.s32.totalorder %s747_s19, 1 }
   0x7   : > { %p129_p3 = scmp.ne.s32.totalorder %s996_s16, %s992_s15  ;;  %p130_p4 = scmp.eq.s32.totalorder %s748_s20, 1 }
   0x8   : > { %s1068_s24 = scalar_select %p111_p1, %s1000_s17, %s113_s22  }
   0x9   : > { %p1070_p5 = por %p124_p2, %p123_p0  ;;  %p1074_p6 = por %p130_p4, %p129_p3 }
   0xa   : > { %p751_p7 = scmp.ge.s32.totalorder %s1004_s18, 1  ;;  %p166_p8 = scmp.lt.s32.totalorder %s1004_s18, 3 }
   0xc   : > { %p167_p9 = pnand %p751_p7, %p166_p8 }
   0xd   : > { %v928_v0 = vld [vmem:[%s1199_s1] sm:$0xff] (!%p167_p9)   ;;  %s1083_s29 = sshll.u32 (!%p167_p9), %s747_s19, 4  ;;  %v929_v1 = vld [vmem:[%s1199_s1 + $0x8] sm:$0xff] (!%p167_p9)   ;;  %v930_v2 = vld [vmem:[%s1199_s1 + $0x10] sm:$0xff] (!%p167_p9)   ;;  %vm291_vm0 = vcmask (!%p167_p9), 523264   ;;  %vm458_vm1 = vcmask (!%p167_p9), 261120  }
   0xe   : > { %170 = sbr.rel (%p167_p9) target bundleno = 765 (0x2fd), region = 36  ;;  %p192_p10 = scmp.lt.s32.totalorder (!%p167_p9), %s1083_s29, 31  ;;  %821 = vmatprep.subr.bf16.mxu0 (!%p167_p9), %v928_v0  ;;  %v931_v4 = vld [vmem:[%s1199_s1 + $0x18] sm:$0xff] (!%p167_p9)   ;;  %v940_v12 = vld [vmem:[%s1200_s2] sm:$0xff] (!%p167_p9)   ;;  %v941_v13 = vld [vmem:[%s1200_s2 + $0x8] sm:$0xff] (!%p167_p9)   ;;  %vm1007_vm2 = vmmov (!%p167_p9), 0  }
   0xf   : > { %822 = vmatpush3.bf16.msra.mxu0 (!%p167_p9), %v928_v0  ;;  %845 = vmatprep.subr.bf16.mxu1 (!%p167_p9), %v940_v12  ;;  %v754_v14 = vld [vmem:[%s1201_s3] ss:$0 sm:$0xff] (!%p167_p9)  ;;  %s189_s10 = sand.u32 (!%p167_p9), 1, %s996_s16   ;;  %s1156_s19 = scalar_lea.hbm (!%p167_p9), %s1202_s4, %s1083_s29 }
  0x10   : > { %823 = vmatprep.subr.bf16.mxu0 (!%p167_p9), %v929_v1  ;;  %846 = vmatpush3.bf16.msra.mxu1 (!%p167_p9), %v940_v12  ;;  %s190_s11 = scalar_lea.vmem (!%p167_p9), [#allocation2], %s189_s10  ;;  %s681_s20 = scalar_lea.sflag (!%p167_p9), [#allocation3], %s189_s10 }
  0x11   : > { %847 = vmatprep.subr.bf16.mxu1 (!%p167_p9), %v941_v13  ;;  %s1009_s23 = smov (!%p167_p9), [#allocation2]  }
  0x12   : > { %s946_s27 = sshll.u32 (!%p167_p9), %s1009_s23, 4  ;;  %s947_s27 = int_to_ptr.vmem [resolvable:$false] %s946_s27 }
  0x13   : > { %824 = vmatpush3.bf16.msra.mxu0 (!%p167_p9), %v929_v1  ;;  %s948_s28 = scalar_lea.vmem (!%p167_p9), %s947_s27, 32 }
  0x14   : > { %825 = vmatprep.subr.bf16.mxu0 (!%p167_p9), %v930_v2  ;;  %848 = vmatpush3.bf16.msra.mxu1 (!%p167_p9), %v941_v13 }
  0x15   : > { %s193_s8 = scalar_select %p192_p10, %s1083_s29, 31 }
  0x17   : > { %s753_s9 = sshll.u32 %s193_s8, 2  ;;  %826 = vmatpush3.bf16.msra.mxu0 %v930_v2 }
  0x18   : > { %s195_s12 = scalar_lea.vmem %s1198_s0, %s753_s9  ;;  %827 = vmatprep.subr.bf16.mxu0 %v931_v4 }
  0x19   : > { %v932_v3 = vld [vmem:[%s195_s12] sm:$0xff]   ;;  %v933_v5 = vld [vmem:[%s195_s12 + $0x8] sm:$0xff]   ;;  %v934_v6 = vld [vmem:[%s195_s12 + $0x10] sm:$0xff]  }
  0x1a   : > { %829 = vmatprep.mubr.msk.bf16.mxu0 %vm291_vm0, %v932_v3  ;;  %v935_v7 = vld [vmem:[%s195_s12 + $0x18] sm:$0xff]   ;;  %v936_v8 = vld [vmem:[%s195_s12 + $0x20] sm:$0xff]   ;;  %v937_v9 = vld [vmem:[%s195_s12 + $0x28] sm:$0xff]  }
  0x1b   : > { %828 = vmatpush3.bf16.msra.mxu0 %v931_v4  ;;  %v938_v10 = vld [vmem:[%s195_s12 + $0x30] sm:$0xff]   ;;  %v939_v11 = vld [vmem:[%s195_s12 + $0x38] sm:$0xff]   ;;  %s693_s12 = sshll.u32 %s190_s11, 4  ;;  %s1158_s12 = int_to_ptr.vmem [resolvable:$true] %s693_s12 }
  0x1c   : > { %s942_s22 = scalar_lea.vmem %s1158_s12, 16  ;;  %p949_p0 = scmp.lt.s32.totalorder %s1158_s12, %s947_s27 }
  0x1d   : > { %p943_p11 = scmp.ne.s32.totalorder %s1158_s12, %s942_s22  ;;  %p950_p1 = scmp.lt.s32.totalorder %s948_s28, %s942_s22 }
  0x1e   : > { %830 = vmatmul.mubr.msk.bf16.vlgmr.msra.gmra.mrb[0].mxu0 %vm291_vm0, %v933_v5 }
  0x1f   : > { %833 = vmatprep.mubr.msk.bf16.mxu0 %vm291_vm0, %v934_v6  ;;  %p944_p12 = pnand %p943_p11, %p1070_p5  ;;  %p951_p2 = por %p950_p1, %p949_p0 }
  0x21   : > { %p945_p13 = pneg %p944_p12 }
  0x23   : > { %p952_p3 = pnand %p951_p2, %p945_p13 }
  0x26   : > { %834 = vmatmul.mubr.msk.bf16.gmra.mrb[4].mxu0 %vm291_vm0, %v935_v7  ;;  %v1006_v7 = vmov 0.0  }
  0x27   : > { %837 = vmatprep.mubr.msk.bf16.mxu0 %vm291_vm0, %v936_v8  ;;  %865 = vmatprep.subr.bf16.mxu1 %v1006_v7  ;;  %v606_v8 = vld [vmem:[%s1201_s3 + $0x3] sm:$0x1] }
  0x2e   : > { %838 = vmatmul.mubr.msk.bf16.gmra.mrb[8].mxu0 %vm291_vm0, %v937_v9  ;;  %v1008_v9 = vmov 0  }
  0x2f   : > { %841 = vmatprep.mubr.msk.bf16.mxu0 %vm291_vm0, %v938_v10  ;;  %927 = vset.pattern.permute.xlu0 %v1008_v9  ;;  %v775_v10 = vld [vmem:[%s1201_s3 + $0x1] ss:$0 sm:$0xff] }
  0x30   : > { %609 = vperm.xlu0 %927, %v606_v8  }
  0x36   : > { %842 = vmatmul.mubr.msk.bf16.gmra.mrb[12].mxu0 %vm291_vm0, %v939_v11 }
  0xf1   : > { %v831_v15 = vpop.f32.mrb[0].mxu0 }
  0xf2   : > { %v359_v16 = vadd.f32 %v831_v15, %v754_v14  ;;  %v350_v17 = vpop.f32.mrb[1].mxu0 }
  0xf3   : > { %v351_v18 = vadd.f32 %v754_v14, %v350_v17  ;;  %v832_v19 = vpop.f32.mrb[2].mxu0 }
  0xf4   : > { %v362_v20 = vadd.f32 %v832_v19, %v754_v14  ;;  %v353_v21 = vpop.f32.mrb[3].mxu0  ;;  %v415_v23 = vmax.f32 %v359_v16, 0.0 }
  0xf5   : > { %v354_v22 = vadd.f32 %v754_v14, %v353_v21  ;;  %v413_v25 = vmax.f32 %v351_v18, 0.0 }
  0xf6   : > { %v416_v24 = vmax.f32 %v362_v20, 0.0 }
  0xf7   : > { %v414_v26 = vmax.f32 %v354_v22, 0.0 }
  0xf8   : > { %v430_v27 = vpack.c.bf16 %v416_v24, %v415_v23 }
  0xf9   : > { %v835_v28 = vpop.f32.mrb[4].mxu0  ;;  %v429_v29 = vpack.c.bf16 %v414_v26, %v413_v25 }
  0xfa   : > { %v375_v30 = vadd.f32 %v835_v28, %v754_v14  ;;  %v366_v31 = vpop.f32.mrb[5].mxu0 }
  0xfb   : > { %v367_v32 = vadd.f32 %v754_v14, %v366_v31  ;;  %849 = vmatprep.mubr.msk.bf16.mxu1 %vm458_vm1, %v429_v29  ;;  %v836_v33 = vpop.f32.mrb[6].mxu0 }
  0xfc   : > { %v419_v34 = vmax.f32 %v375_v30, 0.0  ;;  %v378_v35 = vadd.f32 %v836_v33, %v754_v14  ;;  %850 = vmatmul.mubr.msk.bf16.vlgmr.msra.gmra.mrb[0].mxu1 %vm458_vm1, %v430_v27  ;;  %v369_v36 = vpop.f32.mrb[7].mxu0 }
  0xfd   : > { %v417_v37 = vmax.f32 %v367_v32, 0.0  ;;  %v370_v38 = vadd.f32 %v754_v14, %v369_v36 }
  0xfe   : > { %v420_v39 = vmax.f32 %v378_v35, 0.0 }
  0xff   : > { %v418_v40 = vmax.f32 %v370_v38, 0.0 }
 0x100   : > { %v432_v41 = vpack.c.bf16 %v420_v39, %v419_v34 }
 0x101   : > { %v431_v42 = vpack.c.bf16 %v418_v40, %v417_v37  ;;  %v839_v43 = vpop.f32.mrb[8].mxu0 }
 0x102   : > { %v391_v44 = vadd.f32 %v839_v43, %v754_v14  ;;  %v382_v45 = vpop.f32.mrb[9].mxu0 }
 0x103   : > { %853 = vmatprep.mubr.msk.bf16.mxu1 %vm458_vm1, %v431_v42  ;;  %v383_v46 = vadd.f32 %v754_v14, %v382_v45  ;;  %v840_v47 = vpop.f32.mrb[10].mxu0 }
 0x104   : > { %854 = vmatmul.mubr.msk.bf16.gmra.mrb[4].mxu1 %vm458_vm1, %v432_v41  ;;  %v423_v48 = vmax.f32 %v391_v44, 0.0  ;;  %v394_v49 = vadd.f32 %v840_v47, %v754_v14  ;;  %v385_v50 = vpop.f32.mrb[11].mxu0 }
 0x105   : > { %v421_v51 = vmax.f32 %v383_v46, 0.0  ;;  %v386_v52 = vadd.f32 %v754_v14, %v385_v50 }
 0x106   : > { %v424_v53 = vmax.f32 %v394_v49, 0.0 }
 0x107   : > { %v422_v54 = vmax.f32 %v386_v52, 0.0 }
 0x108   : > { %v434_v55 = vpack.c.bf16 %v424_v53, %v423_v48 }
 0x109   : > { %v433_v56 = vpack.c.bf16 %v422_v54, %v421_v51  ;;  %v843_v57 = vpop.f32.mrb[12].mxu0 }
 0x10a   : > { %v407_v58 = vadd.f32 %v843_v57, %v754_v14  ;;  %v398_v59 = vpop.f32.mrb[13].mxu0 }
 0x10b   : > { %857 = vmatprep.mubr.msk.bf16.mxu1 %vm458_vm1, %v433_v56  ;;  %v399_v60 = vadd.f32 %v754_v14, %v398_v59  ;;  %v844_v61 = vpop.f32.mrb[14].mxu0 }
 0x10c   : > { %858 = vmatmul.mubr.msk.bf16.gmra.mrb[8].mxu1 %vm458_vm1, %v434_v55  ;;  %v427_v62 = vmax.f32 %v407_v58, 0.0  ;;  %v410_v63 = vadd.f32 %v844_v61, %v754_v14  ;;  %v401_v0 = vpop.f32.mrb[15].mxu0 }
 0x10d   : > { %v425_v1 = vmax.f32 %v399_v60, 0.0  ;;  %v402_v2 = vadd.f32 %v754_v14, %v401_v0 }
 0x10e   : > { %v428_v3 = vmax.f32 %v410_v63, 0.0 }
 0x10f   : > { %v426_v4 = vmax.f32 %v402_v2, 0.0 }
 0x110   : > { %v436_v5 = vpack.c.bf16 %v428_v3, %v427_v62 }
 0x111   : > { %v435_v6 = vpack.c.bf16 %v426_v4, %v425_v1 }
 0x113   : > { %861 = vmatprep.mubr.msk.bf16.mxu1 %vm458_vm1, %v435_v6 }
 0x114   : > { %862 = vmatmul.mubr.msk.bf16.gmra.mrb[12].mxu1 %vm458_vm1, %v436_v5 }
 0x115   : > { %881 = vmatprep.mubr.msk.bf16.mxu1 %vm1007_vm2, %v1006_v7 }
 0x1cf   : > { %v851_v11 = vpop.f32.mrb[0].mxu1 }
 0x1d0   : > { %v526_v12 = vadd.f32 %v851_v11, %v775_v10  ;;  %v517_v13 = vpop.f32.mrb[1].mxu1 }
 0x1d1   : > { %v518_v14 = vadd.f32 %v775_v10, %v517_v13  ;;  %v852_v15 = vpop.f32.mrb[2].mxu1 }
 0x1d2   : > { %v529_v16 = vadd.f32 %v852_v15, %v775_v10  ;;  %v520_v17 = vpop.f32.mrb[3].mxu1  ;;  %v582_v19 = vmax.f32 %v526_v12, 0.0  ;;  %v596_v12 = vld [vmem:[%s1201_s3 + $0x2] sm:$0x1] }
 0x1d3   : > { %v521_v18 = vadd.f32 %v775_v10, %v520_v17  ;;  %v580_v21 = vmax.f32 %v518_v14, 0.0  ;;  %v597_v13 = vpack.c.bf16 %v596_v12, %v596_v12  ;;  %v610_v14 = vpop.permute.xlu0 %609 }
 0x1d4   : > { %v583_v20 = vmax.f32 %v529_v16, 0.0 }
 0x1d5   : > { %v581_v22 = vmax.f32 %v521_v18, 0.0 }
 0x1d6   : > { %v599_v23 = vpack.c.bf16 %v583_v20, %v582_v19 }
 0x1d7   : > { %v598_v24 = vpack.c.bf16 %v581_v22, %v580_v21  ;;  %v855_v25 = vpop.f32.mrb[4].mxu1 }
 0x1d8   : > { %v542_v26 = vadd.f32 %v855_v25, %v775_v10  ;;  %v533_v27 = vpop.f32.mrb[5].mxu1  ;;  %v619_v43 = vsel %vm458_vm1, %v599_v23, 0 }
 0x1d9   : > { %v534_v28 = vadd.f32 %v775_v10, %v533_v27  ;;  %v856_v29 = vpop.f32.mrb[6].mxu1  ;;  %v616_v30 = vsel %vm458_vm1, %v598_v24, 0 }
 0x1da   : > { %v586_v31 = vmax.f32 %v542_v26, 0.0  ;;  %v545_v32 = vadd.f32 %v856_v29, %v775_v10  ;;  %866 = vmatpush3.bf16.xpose.msra.mxu1 %v616_v30  ;;  %v536_v33 = vpop.f32.mrb[7].mxu1 }
 0x1db   : > { %v584_v34 = vmax.f32 %v534_v28, 0.0  ;;  %v537_v35 = vadd.f32 %v775_v10, %v536_v33  ;;  %867 = vmatprep.subr.bf16.mxu1 %v1006_v7 }
 0x1dc   : > { %v587_v36 = vmax.f32 %v545_v32, 0.0 }
 0x1dd   : > { %v585_v37 = vmax.f32 %v537_v35, 0.0 }
 0x1de   : > { %v601_v38 = vpack.c.bf16 %v587_v36, %v586_v31 }
 0x1df   : > { %v600_v39 = vpack.c.bf16 %v585_v37, %v584_v34  ;;  %v859_v40 = vpop.f32.mrb[8].mxu1 }
 0x1e0   : > { %v558_v41 = vadd.f32 %v859_v40, %v775_v10  ;;  %v549_v42 = vpop.f32.mrb[9].mxu1  ;;  %v625_v6 = vsel %vm458_vm1, %v601_v38, 0 }
 0x1e1   : > { %v550_v44 = vadd.f32 %v775_v10, %v549_v42  ;;  %v860_v45 = vpop.f32.mrb[10].mxu1  ;;  %v622_v58 = vsel %vm458_vm1, %v600_v39, 0 }
 0x1e2   : > { %868 = vmatpush3.bf16.xpose.msra.mxu1 %v619_v43  ;;  %v590_v46 = vmax.f32 %v558_v41, 0.0  ;;  %v561_v47 = vadd.f32 %v860_v45, %v775_v10  ;;  %v552_v48 = vpop.f32.mrb[11].mxu1 }
 0x1e3   : > { %v588_v49 = vmax.f32 %v550_v44, 0.0  ;;  %869 = vmatprep.subr.bf16.mxu1 %v1006_v7  ;;  %v553_v50 = vadd.f32 %v775_v10, %v552_v48 }
 0x1e4   : > { %v591_v51 = vmax.f32 %v561_v47, 0.0 }
 0x1e5   : > { %v589_v52 = vmax.f32 %v553_v50, 0.0 }
 0x1e6   : > { %v603_v53 = vpack.c.bf16 %v591_v51, %v590_v46 }
 0x1e7   : > { %v602_v54 = vpack.c.bf16 %v589_v52, %v588_v49  ;;  %v863_v55 = vpop.f32.mrb[12].mxu1 }
 0x1e8   : > { %v574_v56 = vadd.f32 %v863_v55, %v775_v10  ;;  %v565_v57 = vpop.f32.mrb[13].mxu1  ;;  %v631_v9 = vsel %vm458_vm1, %v603_v53, 0 }
 0x1e9   : > { %v566_v59 = vadd.f32 %v775_v10, %v565_v57  ;;  %v864_v60 = vpop.f32.mrb[14].mxu1  ;;  %v628_v8 = vsel %vm458_vm1, %v602_v54, 0 }
 0x1ea   : > { %870 = vmatpush3.bf16.xpose.msra.mxu1 %v622_v58  ;;  %v594_v61 = vmax.f32 %v574_v56, 0.0  ;;  %v577_v62 = vadd.f32 %v864_v60, %v775_v10  ;;  %v568_v63 = vpop.f32.mrb[15].mxu1 }
 0x1eb   : > { %871 = vmatprep.subr.bf16.mxu1 %v1006_v7  ;;  %v592_v0 = vmax.f32 %v566_v59, 0.0  ;;  %v569_v1 = vadd.f32 %v775_v10, %v568_v63 }
 0x1ec   : > { %v595_v2 = vmax.f32 %v577_v62, 0.0 }
 0x1ed   : > { %v593_v3 = vmax.f32 %v569_v1, 0.0 }
 0x1ee   : > { %v605_v4 = vpack.c.bf16 %v595_v2, %v594_v61 }
 0x1ef   : > { %v604_v5 = vpack.c.bf16 %v593_v3, %v592_v0 }
 0x1f0   : > { %v637_v11 = vsel %vm458_vm1, %v605_v4, 0 }
 0x1f1   : > { %v634_v10 = vsel %vm458_vm1, %v604_v5, 0 }
 0x1f2   : > { %872 = vmatpush3.bf16.xpose.msra.mxu1 %v625_v6 }
 0x1f3   : > { %873 = vmatprep.subr.bf16.mxu1 %v1006_v7 }
 0x1fa   : > { %874 = vmatpush3.bf16.xpose.msra.mxu1 %v628_v8 }
 0x1fb   : > { %875 = vmatprep.subr.bf16.mxu1 %v1006_v7 }
 0x202   : > { %876 = vmatpush3.bf16.xpose.msra.mxu1 %v631_v9 }
 0x203   : > { %877 = vmatprep.subr.bf16.mxu1 %v1006_v7 }
 0x20a   : > { %878 = vmatpush3.bf16.xpose.msra.mxu1 %v634_v10 }
 0x20b   : > { %879 = vmatprep.subr.bf16.mxu1 %v1006_v7 }
 0x212   : > { %880 = vmatpush3.bf16.xpose.msra.mxu1 %v637_v11 }
 0x219   : > { %882 = vmatmul.mubr.msk.bf16.vlgmr.msra.gmra.mrb[16].mxu1 %vm458_vm1, %v597_v13 }
 0x2ec   : > { %v673_v15 = vpop.f32.mrb[16].mxu1 }
 0x2ed   : > { %v674_v16 = vadd.f32 %v673_v15, %v610_v14  ;;  %v883_v17 = vpop.f32.mrb[17].mxu1 }
 0x2ee   : > { %v676_v7 = vpop.f32.mrb[18].mxu1 }
 0x2ef   : > { %679 = vst [vmem:[%s190_s11] sm:$0x1] %v674_v16  ;;  %v884_v18 = vpop.f32.mrb[19].mxu1 }
 0x2f0   : > { %955 = shalt.err (!%p952_p3)
}
 0x2f1   : > { %s956_s29 = scalar_lea.hbm %s1156_s19, 16  ;;  %s960_s6 = scalar_lea.hbm %s1202_s4, 32 }
 0x2f2   : > { %p957_p4 = scmp.ne.s32.totalorder %s1156_s19, %s956_s29  ;;  %p961_p9 = scmp.lt.u32.totalorder %s1156_s19, %s1202_s4 }
 0x2f3   : > { %p962_p10 = scmp.lt.u32.totalorder %s960_s6, %s956_s29  ;;  %p964_p12 = scmp.lt.u32.totalorder %s956_s29, %s1156_s19 }
 0x2f4   : > { %p958_p7 = pnand %p957_p4, %p1070_p5 }
 0x2f5   : > { %p963_p11 = por %p962_p10, %p961_p9 }
 0x2f6   : > { %p959_p8 = pneg %p958_p7 }
 0x2f7   : > { %p965_p13 = por %p964_p12, %p963_p11 }
 0x2f9   : > { %p966_p0 = pnand %p965_p13, %p959_p8 }
 0x2fb   : > { %969 = shalt.err (!%p966_p0)
}
 0x2fc   : > { %885 = dma.vmem_to_hbm [thread:$0]  (%p1070_p5), %s1158_s12, 16, %s1156_s19, %s681_s20  }
 0x2fd PF: > { %p891_p1 = scmp.ge.s32.totalorder %s1004_s18, 2  ;;  %s705_s9 = sand.u32 1, %s992_s15  }
 0x2fe   : > { %s706_s10 = scalar_lea.sflag [#allocation3], %s705_s9 }
 0x2ff   : > { %p888_p2 = pnand %p891_p1, %p1074_p6 }
 0x301   : > { %987 = dma.done.wait (!%p888_p2), %s706_s10, 16  }
 0x302   : > { %989 = vsyncadd (!%p888_p2), %s706_s10, 4294967280  ;;  %p14_p3 = scmp.ge.s32.totalorder %s1058_s21, 4   ;;  %s1205_s15 = smov %s996_s16 }
 0x303   : > { %s1206_s16 = smov %s1000_s17  ;;  %s1207_s17 = smov %s1068_s24 }
 0x304   : > { %s1208_s18 = smov %s1058_s21  ;;  %16 = sbr.rel (!%p14_p3) target bundleno = 3 (0x3), region = 71 }
 0x30b   :  { %710 = vsyncpa [#allocation3], 1 }
 0x30c   :  { %712 = vsyncpa [#allocation3 + $0x1], 1 }

</bundles_post_ra>
